<compile_context>
chip_gen: v6e
topology: v6e:2x2x1
jax: 0.10.0
libtpu: 0.0.40
codegen_flags: <defaults>
</compile_context>

<pallas_src>
import jax
import jax.numpy as jnp
from jax.experimental import pallas as pl
from jax.experimental.pallas import tpu as pltpu

INPUT_SIZE = 5
HIDDEN_SIZE = 50
NUM_CLASSES = 1

# Padded (TPU-friendly) extents: feature dims live on the sublane axis in the
# transposed layout (multiple of 8); the batch tile lives on the lane axis.
INPUT_PAD = 8     # 5  -> 8
HIDDEN_PAD = 56   # 50 -> 56
OUT_PAD = 8       # 1  -> 8
CHUNK = 256       # lane-chunk kept vreg-resident through the whole layer chain
MAX_TB = 16384    # max batch tile (lane axis), multiple of CHUNK


def _round_up(a, m):
    return ((a + m - 1) // m) * m


def mlp_kernel(x_ref, w1_ref, b1_ref, w2_ref, b2_ref, w3_ref, b3_ref,
               w4_ref, b4_ref, o_ref):
    # x_ref: (INPUT_PAD, TB); weights (out_pad, in_pad); biases (out_pad, 1).
    # Weights/biases are loop-invariant -> load once (VMEM-resident across grid).
    w1 = w1_ref[...]; b1 = b1_ref[...]
    w2 = w2_ref[...]; b2 = b2_ref[...]
    w3 = w3_ref[...]; b3 = b3_ref[...]
    w4 = w4_ref[...]; b4 = b4_ref[...]

    n_chunks = x_ref.shape[1] // CHUNK  # static (block shape)

    # Fuse the whole layer chain per 256-column chunk: the (56, CHUNK) f32
    # intermediates (~14 vregs) stay in registers instead of bouncing
    # (56, TB) temporaries through VMEM between layers.
    @pl.loop(0, n_chunks)
    def _(c):
        start = pl.multiple_of(c * CHUNK, CHUNK)
        xc = x_ref[:, pl.ds(start, CHUNK)]
        h = jnp.maximum(
            jnp.dot(w1, xc, preferred_element_type=jnp.float32) + b1, 0.0)
        h = jnp.maximum(
            jnp.dot(w2, h, preferred_element_type=jnp.float32) + b2, 0.0)
        h = jnp.maximum(
            jnp.dot(w3, h, preferred_element_type=jnp.float32) + b3, 0.0)
        h = jnp.dot(w4, h, preferred_element_type=jnp.float32) + b4
        o_ref[:, pl.ds(start, CHUNK)] = jax.nn.sigmoid(h)  # lane-dense store


def init_params(key):
    """Torch-layout params: w (out_features, in_features), b (out_features,),
    with PyTorch Linear's default U[-1/sqrt(fan_in), +1/sqrt(fan_in)] init."""
    def linear(key, fan_in, fan_out):
        kw, kb = jax.random.split(key)
        bound = 1.0 / jnp.sqrt(jnp.float32(fan_in))
        w = jax.random.uniform(kw, (fan_out, fan_in), jnp.float32, -bound, bound)
        b = jax.random.uniform(kb, (fan_out,), jnp.float32, -bound, bound)
        return w, b

    k1, k2, k3, k4 = jax.random.split(key, 4)
    w1, b1 = linear(k1, INPUT_SIZE, HIDDEN_SIZE)
    w2, b2 = linear(k2, HIDDEN_SIZE, HIDDEN_SIZE)
    w3, b3 = linear(k3, HIDDEN_SIZE, HIDDEN_SIZE)
    w4, b4 = linear(k4, HIDDEN_SIZE, NUM_CLASSES)
    return {"w1": w1, "b1": b1, "w2": w2, "b2": b2,
            "w3": w3, "b3": b3, "w4": w4, "b4": b4}


def pad_params(params):
    """Zero-pad torch-layout params to the kernel's padded layout.
    Zero padding guarantees padded rows/cols contribute exactly 0."""
    def pad_w(w, out_pad, in_pad):
        o, i = w.shape
        return jnp.zeros((out_pad, in_pad), jnp.float32).at[:o, :i].set(w)

    def pad_b(b, out_pad):
        return jnp.zeros((out_pad, 1), jnp.float32).at[:b.shape[0], 0].set(b)

    return {
        "w1": pad_w(params["w1"], HIDDEN_PAD, INPUT_PAD),
        "b1": pad_b(params["b1"], HIDDEN_PAD),
        "w2": pad_w(params["w2"], HIDDEN_PAD, HIDDEN_PAD),
        "b2": pad_b(params["b2"], HIDDEN_PAD),
        "w3": pad_w(params["w3"], HIDDEN_PAD, HIDDEN_PAD),
        "b3": pad_b(params["b3"], HIDDEN_PAD),
        "w4": pad_w(params["w4"], OUT_PAD, HIDDEN_PAD),
        "b4": pad_b(params["b4"], OUT_PAD),
    }


def neural_net_forward(x, kparams):
    """x: (B, INPUT_SIZE) float32; kparams: padded params from pad_params()."""
    B = x.shape[0]
    B_r = _round_up(max(B, 1), CHUNK)
    # Prefer two balanced tiles (so both v7x TensorCores get work), capped at
    # MAX_TB columns per tile; always a multiple of CHUNK.
    TB = min(MAX_TB, max(CHUNK, _round_up((B_r + 1) // 2, CHUNK)))
    n_tiles = pl.cdiv(B_r, TB)
    B_pad = n_tiles * TB

    # (B, input) -> zero-padded transposed (INPUT_PAD, B_pad): batch on lanes.
    x_t = jnp.zeros((INPUT_PAD, B_pad), jnp.float32).at[:INPUT_SIZE, :B].set(x.T)

    const = lambda i: (0, 0)                     # weights resident across grid
    w_spec = lambda shape: pl.BlockSpec(shape, const)

    out_t = pl.pallas_call(
        mlp_kernel,
        out_shape=jax.ShapeDtypeStruct((OUT_PAD, B_pad), jnp.float32),
        grid=(n_tiles,),
        in_specs=[
            pl.BlockSpec((INPUT_PAD, TB), lambda i: (0, i)),      # x tile
            w_spec((HIDDEN_PAD, INPUT_PAD)),  w_spec((HIDDEN_PAD, 1)),
            w_spec((HIDDEN_PAD, HIDDEN_PAD)), w_spec((HIDDEN_PAD, 1)),
            w_spec((HIDDEN_PAD, HIDDEN_PAD)), w_spec((HIDDEN_PAD, 1)),
            w_spec((OUT_PAD, HIDDEN_PAD)),    w_spec((OUT_PAD, 1)),
        ],
        out_specs=pl.BlockSpec((OUT_PAD, TB), lambda i: (0, i)),
        compiler_params=pltpu.CompilerParams(
            dimension_semantics=("parallel",),   # 2 TCs on v7x split the grid
            vmem_limit_bytes=32 * 1024 * 1024,   # ~3 MiB actually used; safe on v7x
        ),
    )(x_t,
      kparams["w1"], kparams["b1"],
      kparams["w2"], kparams["b2"],
      kparams["w3"], kparams["b3"],
      kparams["w4"], kparams["b4"])

    # Strip feature/batch padding and return torch-shaped (B, NUM_CLASSES).
    return out_t[:NUM_CLASSES, :B].T


def reference_forward(x, p):
    """Pure-JAX reference with PyTorch Linear semantics (out = x @ W.T + b)."""
    h = jnp.maximum(x @ p["w1"].T + p["b1"], 0.0)
    h = jnp.maximum(h @ p["w2"].T + p["b2"], 0.0)
    h = jnp.maximum(h @ p["w3"].T + p["b3"], 0.0)
    return jax.nn.sigmoid(h @ p["w4"].T + p["b4"])


if __name__ == "__main__":
    key = jax.random.PRNGKey(0)
    kx, kp = jax.random.split(key)

    B = 8
    x = jax.random.normal(kx, (B, INPUT_SIZE), jnp.float32)
    params = init_params(kp)
    kparams = pad_params(params)

    out = neural_net_forward(x, kparams)
    out = jax.block_until_ready(out)

    ref = reference_forward(x, params)
    assert out.shape == (B, NUM_CLASSES)
    assert jnp.allclose(out, ref, atol=1e-4, rtol=1e-4), (
        f"max abs err {jnp.max(jnp.abs(out - ref))}")

    print("KERNEL_OK")
</pallas_src>

<mosaic_0001>
module attributes {stable_mosaic.version = 11 : i64} {
  func.func @mlp_kernel(%arg0: i32, %arg1: memref<8x256xf32, #tpu.memory_space<vmem>>, %arg2: memref<56x8xf32, #tpu.memory_space<vmem>>, %arg3: memref<56x1xf32, #tpu.memory_space<vmem>>, %arg4: memref<56x56xf32, #tpu.memory_space<vmem>>, %arg5: memref<56x1xf32, #tpu.memory_space<vmem>>, %arg6: memref<56x56xf32, #tpu.memory_space<vmem>>, %arg7: memref<56x1xf32, #tpu.memory_space<vmem>>, %arg8: memref<8x56xf32, #tpu.memory_space<vmem>>, %arg9: memref<8x1xf32, #tpu.memory_space<vmem>>, %arg10: memref<8x256xf32, #tpu.memory_space<vmem>>) attributes {dimension_semantics = [#tpu.dimension_semantics<parallel>], iteration_bounds = array<i64: 1>, scalar_prefetch = 0 : i64, scratch_operands = 0 : i64, tpu.core_type = #tpu.core_type<tc>, window_params = [{transform_indices = @transform_0, window_bounds = array<i64: 8, 256>}, {pipeline_mode = #tpu.pipeline_mode<synchronous>, transform_indices = @transform_1, window_bounds = array<i64: 56, 8>}, {pipeline_mode = #tpu.pipeline_mode<synchronous>, transform_indices = @transform_2, window_bounds = array<i64: 56, 1>}, {pipeline_mode = #tpu.pipeline_mode<synchronous>, transform_indices = @transform_3, window_bounds = array<i64: 56, 56>}, {pipeline_mode = #tpu.pipeline_mode<synchronous>, transform_indices = @transform_4, window_bounds = array<i64: 56, 1>}, {pipeline_mode = #tpu.pipeline_mode<synchronous>, transform_indices = @transform_5, window_bounds = array<i64: 56, 56>}, {pipeline_mode = #tpu.pipeline_mode<synchronous>, transform_indices = @transform_6, window_bounds = array<i64: 56, 1>}, {pipeline_mode = #tpu.pipeline_mode<synchronous>, transform_indices = @transform_7, window_bounds = array<i64: 8, 56>}, {pipeline_mode = #tpu.pipeline_mode<synchronous>, transform_indices = @transform_8, window_bounds = array<i64: 8, 1>}, {transform_indices = @transform_9, window_bounds = array<i64: 8, 256>}]} {
    %c0 = arith.constant 0 : index
    %c0_0 = arith.constant 0 : index
    %0 = vector.load %arg2[%c0, %c0_0] : memref<56x8xf32, #tpu.memory_space<vmem>>, vector<56x8xf32>
    %c0_1 = arith.constant 0 : index
    %c0_2 = arith.constant 0 : index
    %1 = vector.load %arg3[%c0_1, %c0_2] : memref<56x1xf32, #tpu.memory_space<vmem>>, vector<56x1xf32>
    %c0_3 = arith.constant 0 : index
    %c0_4 = arith.constant 0 : index
    %2 = vector.load %arg4[%c0_3, %c0_4] : memref<56x56xf32, #tpu.memory_space<vmem>>, vector<56x56xf32>
    %c0_5 = arith.constant 0 : index
    %c0_6 = arith.constant 0 : index
    %3 = vector.load %arg5[%c0_5, %c0_6] : memref<56x1xf32, #tpu.memory_space<vmem>>, vector<56x1xf32>
    %c0_7 = arith.constant 0 : index
    %c0_8 = arith.constant 0 : index
    %4 = vector.load %arg6[%c0_7, %c0_8] : memref<56x56xf32, #tpu.memory_space<vmem>>, vector<56x56xf32>
    %c0_9 = arith.constant 0 : index
    %c0_10 = arith.constant 0 : index
    %5 = vector.load %arg7[%c0_9, %c0_10] : memref<56x1xf32, #tpu.memory_space<vmem>>, vector<56x1xf32>
    %c0_11 = arith.constant 0 : index
    %c0_12 = arith.constant 0 : index
    %6 = vector.load %arg8[%c0_11, %c0_12] : memref<8x56xf32, #tpu.memory_space<vmem>>, vector<8x56xf32>
    %c0_13 = arith.constant 0 : index
    %c0_14 = arith.constant 0 : index
    %7 = vector.load %arg9[%c0_13, %c0_14] : memref<8x1xf32, #tpu.memory_space<vmem>>, vector<8x1xf32>
    %c0_i32 = arith.constant 0 : i32
    %c1_i32 = arith.constant 1 : i32
    %8 = arith.muli %c0_i32, %c1_i32 : i32
    %c0_i32_15 = arith.constant 0 : i32
    %9 = arith.addi %c0_i32_15, %8 : i32
    %c256_i32 = arith.constant 256 : i32
    %10 = arith.muli %9, %c256_i32 : i32
    %11 = tpu.assume_multiple %10, 256 : i32
    %c0_16 = arith.constant 0 : index
    %12 = arith.index_cast %11 : i32 to index
    %13 = vector.load %arg1[%c0_16, %12] : memref<8x256xf32, #tpu.memory_space<vmem>>, vector<8x256xf32>
    %cst = arith.constant dense<0.000000e+00> : vector<56x256xf32>
    %14 = tpu.matmul %0, %13, %cst {dimension_numbers = #tpu.dot_dimension_numbers<[1], [0], [0], [1], [0, 0, 1, 1], [], []>} : vector<56x8xf32>, vector<8x256xf32>, vector<56x256xf32> -> vector<56x256xf32>
    %15 = vector.broadcast %1 : vector<56x1xf32> to vector<56x256xf32>
    %16 = arith.addf %14, %15 : vector<56x256xf32>
    %cst_17 = arith.constant 0.000000e+00 : f32
    %17 = vector.broadcast %cst_17 : f32 to vector<56x256xf32>
    %18 = arith.maximumf %16, %17 : vector<56x256xf32>
    %cst_18 = arith.constant dense<0.000000e+00> : vector<56x256xf32>
    %19 = tpu.matmul %2, %18, %cst_18 {dimension_numbers = #tpu.dot_dimension_numbers<[1], [0], [0], [1], [0, 0, 1, 1], [], []>} : vector<56x56xf32>, vector<56x256xf32>, vector<56x256xf32> -> vector<56x256xf32>
    %20 = vector.broadcast %3 : vector<56x1xf32> to vector<56x256xf32>
    %21 = arith.addf %19, %20 : vector<56x256xf32>
    %cst_19 = arith.constant 0.000000e+00 : f32
    %22 = vector.broadcast %cst_19 : f32 to vector<56x256xf32>
    %23 = arith.maximumf %21, %22 : vector<56x256xf32>
    %cst_20 = arith.constant dense<0.000000e+00> : vector<56x256xf32>
    %24 = tpu.matmul %4, %23, %cst_20 {dimension_numbers = #tpu.dot_dimension_numbers<[1], [0], [0], [1], [0, 0, 1, 1], [], []>} : vector<56x56xf32>, vector<56x256xf32>, vector<56x256xf32> -> vector<56x256xf32>
    %25 = vector.broadcast %5 : vector<56x1xf32> to vector<56x256xf32>
    %26 = arith.addf %24, %25 : vector<56x256xf32>
    %cst_21 = arith.constant 0.000000e+00 : f32
    %27 = vector.broadcast %cst_21 : f32 to vector<56x256xf32>
    %28 = arith.maximumf %26, %27 : vector<56x256xf32>
    %cst_22 = arith.constant dense<0.000000e+00> : vector<8x256xf32>
    %29 = tpu.matmul %6, %28, %cst_22 {dimension_numbers = #tpu.dot_dimension_numbers<[1], [0], [0], [1], [0, 0, 1, 1], [], []>} : vector<8x56xf32>, vector<56x256xf32>, vector<8x256xf32> -> vector<8x256xf32>
    %30 = vector.broadcast %7 : vector<8x1xf32> to vector<8x256xf32>
    %31 = arith.addf %29, %30 : vector<8x256xf32>
    %32 = arith.negf %31 : vector<8x256xf32>
    %33 = math.exp %32 : vector<8x256xf32>
    %cst_23 = arith.constant 1.000000e+00 : f32
    %34 = vector.broadcast %cst_23 : f32 to vector<8x256xf32>
    %35 = arith.addf %34, %33 : vector<8x256xf32>
    %36 = arith.divf %34, %35 : vector<8x256xf32>
    %c0_24 = arith.constant 0 : index
    %37 = arith.index_cast %11 : i32 to index
    %38 = vector.load %arg10[%c0_24, %37] : memref<8x256xf32, #tpu.memory_space<vmem>>, vector<8x256xf32>
    tpu.vector_store %arg10[%c0_24, %37], %36 {strides = array<i32>} : memref<8x256xf32, #tpu.memory_space<vmem>>, vector<8x256xf32>,
    %c1_i32_25 = arith.constant 1 : i32
    return
  }
  func.func @transform_0(%arg0: i32) -> (i32, i32) {
    %c0_i32 = arith.constant 0 : i32
    %c0_i32_0 = arith.constant 0 : i32
    return %c0_i32, %arg0 : i32, i32
  }
  func.func @transform_1(%arg0: i32) -> (i32, i32) {
    %c0_i32 = arith.constant 0 : i32
    %c0_i32_0 = arith.constant 0 : i32
    %c0_i32_1 = arith.constant 0 : i32
    return %c0_i32, %c0_i32_0 : i32, i32
  }
  func.func @transform_2(%arg0: i32) -> (i32, i32) {
    %c0_i32 = arith.constant 0 : i32
    %c0_i32_0 = arith.constant 0 : i32
    %c0_i32_1 = arith.constant 0 : i32
    return %c0_i32, %c0_i32_0 : i32, i32
  }
  func.func @transform_3(%arg0: i32) -> (i32, i32) {
    %c0_i32 = arith.constant 0 : i32
    %c0_i32_0 = arith.constant 0 : i32
    %c0_i32_1 = arith.constant 0 : i32
    return %c0_i32, %c0_i32_0 : i32, i32
  }
  func.func @transform_4(%arg0: i32) -> (i32, i32) {
    %c0_i32 = arith.constant 0 : i32
    %c0_i32_0 = arith.constant 0 : i32
    %c0_i32_1 = arith.constant 0 : i32
    return %c0_i32, %c0_i32_0 : i32, i32
  }
  func.func @transform_5(%arg0: i32) -> (i32, i32) {
    %c0_i32 = arith.constant 0 : i32
    %c0_i32_0 = arith.constant 0 : i32
    %c0_i32_1 = arith.constant 0 : i32
    return %c0_i32, %c0_i32_0 : i32, i32
  }
  func.func @transform_6(%arg0: i32) -> (i32, i32) {
    %c0_i32 = arith.constant 0 : i32
    %c0_i32_0 = arith.constant 0 : i32
    %c0_i32_1 = arith.constant 0 : i32
    return %c0_i32, %c0_i32_0 : i32, i32
  }
  func.func @transform_7(%arg0: i32) -> (i32, i32) {
    %c0_i32 = arith.constant 0 : i32
    %c0_i32_0 = arith.constant 0 : i32
    %c0_i32_1 = arith.constant 0 : i32
    return %c0_i32, %c0_i32_0 : i32, i32
  }
  func.func @transform_8(%arg0: i32) -> (i32, i32) {
    %c0_i32 = arith.constant 0 : i32
    %c0_i32_0 = arith.constant 0 : i32
    %c0_i32_1 = arith.constant 0 : i32
    return %c0_i32, %c0_i32_0 : i32, i32
  }
  func.func @transform_9(%arg0: i32) -> (i32, i32) {
    %c0_i32 = arith.constant 0 : i32
    %c0_i32_0 = arith.constant 0 : i32
    return %c0_i32, %arg0 : i32, i32
  }
}

</mosaic_0001>

<bundles_post_ra>
// kernel: tpu_custom_call.1
= control target key start
LH: loop header
LB: loop body
LE: loop exit
PB: predicated region body
PF: predicated region fallthrough
CT: control target
= control target key end

     0   :  { %vm114_vm0 = vcmask 64512   ;;  %v780_v4 = vmov 0.0   ;;  %v781_v9 = vmov 0   ;;  %s1018_s0 = inlined_call_operand.vmem [shape: f32[8,256], index: 0, kind: input, shape index: {}]   ;;  %s1019_s1 = inlined_call_operand.vmem [shape: f32[56,8], index: 1, kind: input, shape index: {}]   ;;  %s1020_s2 = inlined_call_operand.vmem [shape: f32[56,1], index: 2, kind: input, shape index: {}]   ;;  %s1021_s3 = inlined_call_operand.vmem [shape: f32[56,56], index: 3, kind: input, shape index: {}]   ;;  %s1022_s4 = inlined_call_operand.vmem [shape: f32[56,1], index: 4, kind: input, shape index: {}]   ;;  %s1023_s5 = inlined_call_operand.vmem [shape: f32[56,56], index: 5, kind: input, shape index: {}]   ;;  %s1024_s6 = inlined_call_operand.vmem [shape: f32[56,1], index: 6, kind: input, shape index: {}]   ;;  %s1025_s7 = inlined_call_operand.vmem [shape: f32[8,56], index: 7, kind: input, shape index: {}]   ;;  %s1026_s8 = inlined_call_operand.vmem [shape: f32[8,1], index: 8, kind: input, shape index: {}]   ;;  %s1027_s9 = inlined_call_operand.hbm [shape: f32[8,256], index: 9, kind: output, shape index: {}]  }
   0x1   :  { %v78_v0 = vld [vmem:[%s1018_s0 + $0x8] sm:$0xff]  ;;  %v77_v1 = vld [vmem:[%s1018_s0] sm:$0xff]  ;;  %200 = vmatprep.mubr.f32.mxu0 %v780_v4  ;;  %224 = vmatprep.mubr.f32.mxu1 %v780_v4  ;;  %v46_v5 = vld [vmem:[%s1020_s2 + $0x30] sm:$0xff] }
   0x2   :  { %166 = vmatprep.subr.mxu0 %v78_v0  ;;  %743 = vmatprep.subr.mxu1 %v78_v0  ;;  %v33_v2 = vld [vmem:[%s1019_s1] sm:$0xff]  ;;  %v34_v7 = vld [vmem:[%s1019_s1 + $0x8] sm:$0xff]  ;;  %v43_v11 = vld [vmem:[%s1020_s2 + $0x18] sm:$0xff] }
   0x3   :  { %v37_v3 = vld [vmem:[%s1019_s1 + $0x20] sm:$0xff]  ;;  %167 = vmatpush1.msra.mxu0 %v77_v1  ;;  %744 = vmatpush1.msra.mxu1 %v77_v1  ;;  %v38_v8 = vld [vmem:[%s1019_s1 + $0x28] sm:$0xff]  ;;  %v35_v12 = vld [vmem:[%s1019_s1 + $0x10] sm:$0xff] }
   0x4   :  { %719 = vmatmul.mubr.msk.f32.vlgmr.msra.gmra.mxu0 %vm114_vm0, %v33_v2  ;;  %723 = vmatmul.mubr.msk.f32.vlgmr.msra.gmra.mxu1 %vm114_vm0, %v37_v3  ;;  %v44_v6 = vld [vmem:[%s1020_s2 + $0x20] sm:$0xff]  ;;  %v45_v10 = vld [vmem:[%s1020_s2 + $0x28] sm:$0xff]  ;;  %v39_v13 = vld [vmem:[%s1019_s1 + $0x30] sm:$0xff] }
   0x5   :  { %206 = vmatprep.mubr.f32.mxu0 %v780_v4  ;;  %230 = vmatprep.mubr.f32.mxu1 %v780_v4 }
   0x6   :  { %748 = vset.pattern.permute.xlu0 %v781_v9  ;;  %749 = vset.pattern.permute.xlu1 %v781_v9 }
   0x7   :  { %111 = vperm.xlu0 %748, %v46_v5   ;;  %101 = vperm.xlu1 %749, %v44_v6  }
   0x8   :  { %720 = vmatmul.mubr.msk.f32.gmra.mxu0 %vm114_vm0, %v34_v7  ;;  %724 = vmatmul.mubr.msk.f32.gmra.mxu1 %vm114_vm0, %v38_v8 }
   0x9   :  { %212 = vmatprep.mubr.f32.mxu0 %v780_v4  ;;  %236 = vmatprep.mubr.f32.mxu1 %v780_v4 }
   0xa   :  { %14 = vsyncpa [#allocation3], 0  ;;  %v42_v14 = vld [vmem:[%s1020_s2 + $0x10] sm:$0xff]  ;;  %v41_v15 = vld [vmem:[%s1020_s2 + $0x8] sm:$0xff]  ;;  %vm292_vm1 = vcmask 457728  }
   0xb   :  { %106 = vperm.xlu0 %748, %v45_v10   ;;  %96 = vperm.xlu1 %749, %v43_v11   ;;  %v36_v16 = vld [vmem:[%s1019_s1 + $0x18] sm:$0xff]  ;;  %v40_v17 = vld [vmem:[%s1020_s2] sm:$0xff]  ;;  %v60_v18 = vld [vmem:[%s1022_s4 + $0x30] sm:$0xff] }
   0xc   :  { %721 = vmatmul.mubr.msk.f32.gmra.mxu0 %vm114_vm0, %v35_v12  ;;  %725 = vmatmul.mubr.msk.f32.gmra.mxu1 %vm114_vm0, %v39_v13  ;;  %v59_v19 = vld [vmem:[%s1022_s4 + $0x28] sm:$0xff]  ;;  %v58_v20 = vld [vmem:[%s1022_s4 + $0x20] sm:$0xff]  ;;  %v57_v21 = vld [vmem:[%s1022_s4 + $0x18] sm:$0xff] }
   0xd   :  { %218 = vmatprep.mubr.f32.mxu0 %v780_v4  ;;  %378 = vmatprep.mubr.f32.mxu1 %v780_v4  ;;  %v56_v22 = vld [vmem:[%s1022_s4 + $0x10] sm:$0xff]  ;;  %v55_v23 = vld [vmem:[%s1022_s4 + $0x8] sm:$0xff]  ;;  %v54_v24 = vld [vmem:[%s1022_s4] sm:$0xff] }
   0xe   :  { %v74_v25 = vld [vmem:[%s1024_s6 + $0x30] sm:$0xff]  ;;  %v73_v26 = vld [vmem:[%s1024_s6 + $0x28] sm:$0xff]  ;;  %v72_v27 = vld [vmem:[%s1024_s6 + $0x20] sm:$0xff] }
   0xf   :  { %91 = vperm.xlu0 %748, %v42_v14   ;;  %86 = vperm.xlu1 %749, %v41_v15   ;;  %v71_v28 = vld [vmem:[%s1024_s6 + $0x18] sm:$0xff]  ;;  %v70_v29 = vld [vmem:[%s1024_s6 + $0x10] sm:$0xff]  ;;  %v69_v30 = vld [vmem:[%s1024_s6 + $0x8] sm:$0xff] }
  0x10   :  { %722 = vmatmul.mubr.msk.f32.gmra.mxu0 %vm114_vm0, %v36_v16  ;;  %v68_v31 = vld [vmem:[%s1024_s6] sm:$0xff] }
  0x11   :  { %555 = vmatprep.mubr.f32.mxu0 %v780_v4  ;;  %v76_v32 = vld [vmem:[%s1026_s8] sm:$0xff] }
  0x13   :  { %81 = vperm.xlu0 %748, %v40_v17   ;;  %289 = vperm.xlu1 %749, %v60_v18  }
  0x17   :  { %284 = vperm.xlu0 %748, %v59_v19   ;;  %279 = vperm.xlu1 %749, %v58_v20   ;;  %v47_v19 = vld [vmem:[%s1021_s3] sm:$0xff]  ;;  %v48_v20 = vld [vmem:[%s1021_s3 + $0x8] sm:$0xff] }
  0x1b   :  { %274 = vperm.xlu0 %748, %v57_v21   ;;  %269 = vperm.xlu1 %749, %v56_v22   ;;  %v49_v21 = vld [vmem:[%s1021_s3 + $0x10] sm:$0xff]  ;;  %v50_v22 = vld [vmem:[%s1021_s3 + $0x18] sm:$0xff] }
  0x1f   :  { %264 = vperm.xlu0 %748, %v55_v23   ;;  %259 = vperm.xlu1 %749, %v54_v24   ;;  %v51_v23 = vld [vmem:[%s1021_s3 + $0x20] sm:$0xff]  ;;  %v52_v24 = vld [vmem:[%s1021_s3 + $0x28] sm:$0xff] }
  0x23   :  { %467 = vperm.xlu0 %748, %v74_v25   ;;  %462 = vperm.xlu1 %749, %v73_v26   ;;  %v53_v25 = vld [vmem:[%s1021_s3 + $0x30] sm:$0xff] }
  0x27   :  { %457 = vperm.xlu0 %748, %v72_v27   ;;  %452 = vperm.xlu1 %749, %v71_v28  }
  0x2b   :  { %447 = vperm.xlu0 %748, %v70_v29   ;;  %442 = vperm.xlu1 %749, %v69_v30  }
  0x2f   :  { %437 = vperm.xlu0 %748, %v68_v31   ;;  %614 = vperm.xlu1 %749, %v76_v32  }
  0x82   :  { %v112_v35 = vpop.permute.xlu0 %111  ;;  %v102_v40 = vpop.permute.xlu1 %101 }
  0x86   :  { %v107_v43 = vpop.permute.xlu0 %106  ;;  %v97_v51 = vpop.permute.xlu1 %96 }
  0x8a   :  { %v92_v56 = vpop.permute.xlu0 %91  ;;  %v87_v2 = vpop.permute.xlu1 %86 }
  0x8e   :  { %v82_v8 = vpop.permute.xlu0 %81 }
  0xc4   :  { %v202_v33 = vpop.f32.mrf.mxu0  ;;  %v226_v34 = vpop.f32.mrf.mxu1 }
  0xc5   :  { %v227_v57 = vadd.f32 %v226_v34, %v102_v40  ;;  %v203_v13 = vadd.f32 %v202_v33, %v82_v8 }
  0xc6   :  { %v204_v36 = vpop.f32.mrf.mxu0  ;;  %v228_v37 = vpop.f32.mrf.mxu1 }
  0xc7   :  { %v229_v54 = vadd.f32 %v228_v37, %v102_v40  ;;  %v251_v3 = vmax.f32 %v227_v57, 0.0  ;;  %v205_v11 = vadd.f32 %v204_v36, %v82_v8  ;;  %v243_v18 = vmax.f32 %v203_v13, 0.0  ;;  %v62_v13 = vld [vmem:[%s1023_s5 + $0x8] sm:$0xff] }
  0xc8   :  { %v208_v38 = vpop.f32.mrf.mxu0  ;;  %v232_v39 = vpop.f32.mrf.mxu1 }
  0xc9   :  { %v233_v52 = vadd.f32 %v232_v39, %v107_v43  ;;  %v252_v0 = vmax.f32 %v229_v54, 0.0  ;;  %v209_v9 = vadd.f32 %v208_v38, %v87_v2  ;;  %v244_v17 = vmax.f32 %v205_v11, 0.0  ;;  %v285_v38 = vpop.permute.xlu0 %284 }
  0xca   :  { %v210_v41 = vpop.f32.mrf.mxu0  ;;  %v234_v42 = vpop.f32.mrf.mxu1 }
  0xcb   :  { %v235_v49 = vadd.f32 %v234_v42, %v107_v43  ;;  %v253_v62 = vmax.f32 %v233_v52, 0.0  ;;  %v211_v6 = vadd.f32 %v210_v41, %v87_v2  ;;  %v245_v16 = vmax.f32 %v209_v9, 0.0 }
  0xcc   :  { %v214_v44 = vpop.f32.mrf.mxu0  ;;  %v238_v45 = vpop.f32.mrf.mxu1 }
  0xcd   :  { %v239_v46 = vadd.f32 %v238_v45, %v112_v35  ;;  %v254_v60 = vmax.f32 %v235_v49, 0.0  ;;  %v215_v5 = vadd.f32 %v214_v44, %v92_v56  ;;  %v246_v15 = vmax.f32 %v211_v6, 0.0 }
  0xce   :  { %v216_v47 = vpop.f32.mrf.mxu0  ;;  %v240_v48 = vpop.f32.mrf.mxu1 }
  0xcf   :  { %v241_v50 = vadd.f32 %v240_v48, %v112_v35  ;;  %v255_v58 = vmax.f32 %v239_v46, 0.0  ;;  %v217_v1 = vadd.f32 %v216_v47, %v92_v56  ;;  %v247_v14 = vmax.f32 %v215_v5, 0.0  ;;  %v290_v35 = vpop.permute.xlu1 %289  ;;  %v275_v46 = vpop.permute.xlu0 %274 }
  0xd0   :  { %v220_v53 = vpop.f32.mrf.mxu0 }
  0xd1   :  { %v256_v55 = vmax.f32 %v241_v50, 0.0  ;;  %v221_v63 = vadd.f32 %v220_v53, %v97_v51  ;;  %v248_v12 = vmax.f32 %v217_v1, 0.0 }
  0xd2   :  { %v222_v59 = vpop.f32.mrf.mxu0 }
  0xd3   :  { %v223_v61 = vadd.f32 %v222_v59, %v97_v51  ;;  %332 = vmatprep.subr.mxu1 %v256_v55  ;;  %v249_v10 = vmax.f32 %v221_v63, 0.0  ;;  %v280_v40 = vpop.permute.xlu1 %279  ;;  %v265_v59 = vpop.permute.xlu0 %264 }
  0xd4   :  { %333 = vmatpush1.msra.mxu1 %v255_v58 }
  0xd5   :  { %334 = vmatprep.subr.mxu1 %v254_v60  ;;  %v250_v7 = vmax.f32 %v223_v61, 0.0 }
  0xd6   :  { %335 = vmatpush1.msra.mxu1 %v253_v62 }
  0xd7   :  { %336 = vmatprep.subr.mxu1 %v252_v0  ;;  %v270_v50 = vpop.permute.xlu1 %269 }
  0xd8   :  { %337 = vmatpush1.msra.mxu1 %v251_v3 }
  0xd9   :  { %338 = vmatprep.subr.mxu1 %v250_v7 }
  0xda   :  { %339 = vmatpush1.msra.mxu1 %v249_v10 }
  0xdb   :  { %340 = vmatprep.subr.mxu1 %v248_v12  ;;  %v260_v0 = vpop.permute.xlu1 %259  ;;  %v61_v12 = vld [vmem:[%s1023_s5] sm:$0xff] }
  0xdc   :  { %341 = vmatpush1.msra.mxu1 %v247_v14  ;;  %v63_v14 = vld [vmem:[%s1023_s5 + $0x10] sm:$0xff] }
  0xdd   :  { %342 = vmatprep.subr.mxu1 %v246_v15  ;;  %v64_v15 = vld [vmem:[%s1023_s5 + $0x18] sm:$0xff] }
  0xde   :  { %343 = vmatpush1.msra.mxu1 %v245_v16  ;;  %v65_v16 = vld [vmem:[%s1023_s5 + $0x20] sm:$0xff] }
  0xdf   :  { %344 = vmatprep.subr.mxu1 %v244_v17  ;;  %v66_v17 = vld [vmem:[%s1023_s5 + $0x28] sm:$0xff] }
  0xe0   :  { %345 = vmatpush1.msra.mxu1 %v243_v18  ;;  %v67_v18 = vld [vmem:[%s1023_s5 + $0x30] sm:$0xff] }
  0xe1   :  { %726 = vmatmul.mubr.msk.f32.vlgmr.msra.gmra.mxu1 %vm292_vm1, %v47_v19 }
  0xe2   :  { %384 = vmatprep.mubr.f32.mxu1 %v780_v4 }
  0xe5   :  { %727 = vmatmul.mubr.msk.f32.gmra.mxu1 %vm292_vm1, %v48_v20 }
  0xe6   :  { %390 = vmatprep.mubr.f32.mxu1 %v780_v4 }
  0xe9   :  { %728 = vmatmul.mubr.msk.f32.gmra.mxu1 %vm292_vm1, %v49_v21 }
  0xea   :  { %396 = vmatprep.mubr.f32.mxu1 %v780_v4 }
  0xed   :  { %729 = vmatmul.mubr.msk.f32.gmra.mxu1 %vm292_vm1, %v50_v22 }
  0xee   :  { %402 = vmatprep.mubr.f32.mxu1 %v780_v4 }
  0xf1   :  { %730 = vmatmul.mubr.msk.f32.gmra.mxu1 %vm292_vm1, %v51_v23 }
  0xf2   :  { %408 = vmatprep.mubr.f32.mxu1 %v780_v4 }
  0xf5   :  { %731 = vmatmul.mubr.msk.f32.gmra.mxu1 %vm292_vm1, %v52_v24 }
  0xf6   :  { %414 = vmatprep.mubr.f32.mxu1 %v780_v4 }
  0xf9   :  { %732 = vmatmul.mubr.msk.f32.gmra.mxu1 %vm292_vm1, %v53_v25 }
  0xfa   :  { %684 = vmatprep.mubr.f32.mxu1 %v780_v4 }
 0x1a1   :  { %v380_v26 = vpop.f32.mrf.mxu1 }
 0x1a2   :  { %v381_v6 = vadd.f32 %v380_v26, %v260_v0 }
 0x1a3   :  { %v382_v27 = vpop.f32.mrf.mxu1 }
 0x1a4   :  { %v383_v3 = vadd.f32 %v382_v27, %v260_v0  ;;  %v421_v11 = vmax.f32 %v381_v6, 0.0 }
 0x1a5   :  { %v386_v28 = vpop.f32.mrf.mxu1 }
 0x1a6   :  { %v387_v1 = vadd.f32 %v386_v28, %v265_v59  ;;  %v422_v10 = vmax.f32 %v383_v3, 0.0  ;;  %v468_v28 = vpop.permute.xlu0 %467  ;;  %v75_v3 = vld [vmem:[%s1025_s7] sm:$0xff]  ;;  %s782_s7 = smov [#allocation2]  }
 0x1a7   :  { %v388_v29 = vpop.f32.mrf.mxu1  ;;  %s711_s8 = sshll.u32 %s782_s7, 4  ;;  %s712_s8 = int_to_ptr.vmem [resolvable:$true] %s711_s8 }
 0x1a8   :  { %v389_v62 = vadd.f32 %v388_v29, %v265_v59  ;;  %v423_v9 = vmax.f32 %v387_v1, 0.0  ;;  %s758_s22 = scalar_lea.vmem %s712_s8, 256  ;;  %p763_p1 = scmp.lt.s32.totalorder %s712_s8, %s712_s8 }
 0x1a9   :  { %v392_v30 = vpop.f32.mrf.mxu1  ;;  %p759_p0 = scmp.ne.s32.totalorder %s712_s8, %s758_s22  ;;  %p764_p2 = scmp.lt.s32.totalorder %s758_s22, %s758_s22 }
 0x1aa   :  { %v393_v60 = vadd.f32 %v392_v30, %v270_v50  ;;  %v424_v8 = vmax.f32 %v389_v62, 0.0 }
 0x1ab   :  { %v394_v31 = vpop.f32.mrf.mxu1  ;;  %p765_p3 = por %p764_p2, %p763_p1 }
 0x1ac   :  { %v395_v57 = vadd.f32 %v394_v31, %v270_v50  ;;  %v425_v7 = vmax.f32 %v393_v60, 0.0  ;;  %v463_v31 = vpop.permute.xlu1 %462 }
 0x1ad   :  { %v398_v32 = vpop.f32.mrf.mxu1  ;;  %p766_p4 = pnand %p765_p3, %p759_p0 }
 0x1ae   :  { %v399_v55 = vadd.f32 %v398_v32, %v275_v46  ;;  %v426_v5 = vmax.f32 %v395_v57, 0.0  ;;  %v458_v32 = vpop.permute.xlu0 %457 }
 0x1af   :  { %v400_v33 = vpop.f32.mrf.mxu1 }
 0x1b0   :  { %v401_v53 = vadd.f32 %v400_v33, %v275_v46  ;;  %v427_v2 = vmax.f32 %v399_v55, 0.0 }
 0x1b1   :  { %v404_v34 = vpop.f32.mrf.mxu1 }
 0x1b2   :  { %v405_v51 = vadd.f32 %v404_v34, %v280_v40  ;;  %v428_v63 = vmax.f32 %v401_v53, 0.0 }
 0x1b3   :  { %v406_v36 = vpop.f32.mrf.mxu1 }
 0x1b4   :  { %v407_v48 = vadd.f32 %v406_v36, %v280_v40  ;;  %v429_v61 = vmax.f32 %v405_v51, 0.0 }
 0x1b5   :  { %v410_v37 = vpop.f32.mrf.mxu1 }
 0x1b6   :  { %v411_v47 = vadd.f32 %v410_v37, %v285_v38  ;;  %v430_v58 = vmax.f32 %v407_v48, 0.0 }
 0x1b7   :  { %v412_v39 = vpop.f32.mrf.mxu1 }
 0x1b8   :  { %v413_v44 = vadd.f32 %v412_v39, %v285_v38  ;;  %v431_v56 = vmax.f32 %v411_v47, 0.0  ;;  %v453_v38 = vpop.permute.xlu1 %452 }
 0x1b9   :  { %v416_v41 = vpop.f32.mrf.mxu1 }
 0x1ba   :  { %v417_v42 = vadd.f32 %v416_v41, %v290_v35  ;;  %v432_v54 = vmax.f32 %v413_v44, 0.0 }
 0x1bb   :  { %v418_v43 = vpop.f32.mrf.mxu1 }
 0x1bc   :  { %v419_v45 = vadd.f32 %v418_v43, %v290_v35  ;;  %v433_v52 = vmax.f32 %v417_v42, 0.0  ;;  %v448_v42 = vpop.permute.xlu0 %447  ;;  %v443_v51 = vpop.permute.xlu1 %442 }
 0x1be   :  { %v434_v49 = vmax.f32 %v419_v45, 0.0 }
 0x1c0   :  { %509 = vmatprep.subr.mxu0 %v434_v49 }
 0x1c1   :  { %510 = vmatpush1.msra.mxu0 %v433_v52 }
 0x1c2   :  { %511 = vmatprep.subr.mxu0 %v432_v54 }
 0x1c3   :  { %512 = vmatpush1.msra.mxu0 %v431_v56  ;;  %v438_v56 = vpop.permute.xlu0 %437 }
 0x1c4   :  { %513 = vmatprep.subr.mxu0 %v430_v58 }
 0x1c5   :  { %514 = vmatpush1.msra.mxu0 %v429_v61 }
 0x1c6   :  { %515 = vmatprep.subr.mxu0 %v428_v63 }
 0x1c7   :  { %516 = vmatpush1.msra.mxu0 %v427_v2 }
 0x1c8   :  { %517 = vmatprep.subr.mxu0 %v426_v5  ;;  %v615_v5 = vpop.permute.xlu1 %614 }
 0x1c9   :  { %518 = vmatpush1.msra.mxu0 %v425_v7 }
 0x1ca   :  { %519 = vmatprep.subr.mxu0 %v424_v8 }
 0x1cb   :  { %520 = vmatpush1.msra.mxu0 %v423_v9 }
 0x1cc   :  { %521 = vmatprep.subr.mxu0 %v422_v10 }
 0x1cd   :  { %522 = vmatpush1.msra.mxu0 %v421_v11 }
 0x1ce   :  { %733 = vmatmul.mubr.msk.f32.vlgmr.msra.gmra.mxu0 %vm292_vm1, %v61_v12 }
 0x1cf   :  { %561 = vmatprep.mubr.f32.mxu0 %v780_v4 }
 0x1d2   :  { %734 = vmatmul.mubr.msk.f32.gmra.mxu0 %vm292_vm1, %v62_v13 }
 0x1d3   :  { %567 = vmatprep.mubr.f32.mxu0 %v780_v4 }
 0x1d6   :  { %735 = vmatmul.mubr.msk.f32.gmra.mxu0 %vm292_vm1, %v63_v14 }
 0x1d7   :  { %573 = vmatprep.mubr.f32.mxu0 %v780_v4 }
 0x1da   :  { %736 = vmatmul.mubr.msk.f32.gmra.mxu0 %vm292_vm1, %v64_v15 }
 0x1db   :  { %579 = vmatprep.mubr.f32.mxu0 %v780_v4 }
 0x1de   :  { %737 = vmatmul.mubr.msk.f32.gmra.mxu0 %vm292_vm1, %v65_v16 }
 0x1df   :  { %585 = vmatprep.mubr.f32.mxu0 %v780_v4 }
 0x1e2   :  { %738 = vmatmul.mubr.msk.f32.gmra.mxu0 %vm292_vm1, %v66_v17 }
 0x1e3   :  { %591 = vmatprep.mubr.f32.mxu0 %v780_v4 }
 0x1e6   :  { %739 = vmatmul.mubr.msk.f32.gmra.mxu0 %vm292_vm1, %v67_v18 }
 0x28e   :  { %v557_v19 = vpop.f32.mrf.mxu0 }
 0x28f   :  { %v558_v61 = vadd.f32 %v557_v19, %v438_v56 }
 0x290   :  { %v559_v20 = vpop.f32.mrf.mxu0 }
 0x291   :  { %v560_v59 = vadd.f32 %v559_v20, %v438_v56  ;;  %v598_v2 = vmax.f32 %v558_v61, 0.0 }
 0x292   :  { %v563_v21 = vpop.f32.mrf.mxu0 }
 0x293   :  { %v564_v57 = vadd.f32 %v563_v21, %v443_v51  ;;  %v599_v1 = vmax.f32 %v560_v59, 0.0 }
 0x294   :  { %v565_v22 = vpop.f32.mrf.mxu0 }
 0x295   :  { %v566_v54 = vadd.f32 %v565_v22, %v443_v51  ;;  %v600_v0 = vmax.f32 %v564_v57, 0.0 }
 0x296   :  { %v569_v23 = vpop.f32.mrf.mxu0 }
 0x297   :  { %v570_v52 = vadd.f32 %v569_v23, %v448_v42  ;;  %v601_v63 = vmax.f32 %v566_v54, 0.0 }
 0x298   :  { %v571_v24 = vpop.f32.mrf.mxu0 }
 0x299   :  { %v572_v49 = vadd.f32 %v571_v24, %v448_v42  ;;  %v602_v62 = vmax.f32 %v570_v52, 0.0 }
 0x29a   :  { %v575_v25 = vpop.f32.mrf.mxu0 }
 0x29b   :  { %v576_v47 = vadd.f32 %v575_v25, %v453_v38  ;;  %v603_v60 = vmax.f32 %v572_v49, 0.0 }
 0x29c   :  { %v577_v26 = vpop.f32.mrf.mxu0 }
 0x29d   :  { %v578_v45 = vadd.f32 %v577_v26, %v453_v38  ;;  %v604_v58 = vmax.f32 %v576_v47, 0.0 }
 0x29e   :  { %v581_v27 = vpop.f32.mrf.mxu0 }
 0x29f   :  { %v582_v43 = vadd.f32 %v581_v27, %v458_v32  ;;  %v605_v55 = vmax.f32 %v578_v45, 0.0 }
 0x2a0   :  { %v583_v29 = vpop.f32.mrf.mxu0 }
 0x2a1   :  { %v584_v40 = vadd.f32 %v583_v29, %v458_v32  ;;  %v606_v53 = vmax.f32 %v582_v43, 0.0 }
 0x2a2   :  { %v587_v30 = vpop.f32.mrf.mxu0 }
 0x2a3   :  { %v588_v39 = vadd.f32 %v587_v30, %v463_v31  ;;  %v607_v50 = vmax.f32 %v584_v40, 0.0 }
 0x2a4   :  { %v589_v4 = vpop.f32.mrf.mxu0 }
 0x2a5   :  { %v590_v36 = vadd.f32 %v589_v4, %v463_v31  ;;  %v608_v48 = vmax.f32 %v588_v39, 0.0 }
 0x2a6   :  { %v593_v33 = vpop.f32.mrf.mxu0 }
 0x2a7   :  { %v594_v34 = vadd.f32 %v593_v33, %v468_v28  ;;  %v609_v46 = vmax.f32 %v590_v36, 0.0 }
 0x2a8   :  { %v595_v35 = vpop.f32.mrf.mxu0 }
 0x2a9   :  { %v596_v37 = vadd.f32 %v595_v35, %v468_v28  ;;  %v610_v44 = vmax.f32 %v594_v34, 0.0 }
 0x2ab   :  { %v611_v41 = vmax.f32 %v596_v37, 0.0 }
 0x2ad   :  { %638 = vmatprep.subr.mxu1 %v611_v41 }
 0x2ae   :  { %639 = vmatpush1.msra.mxu1 %v610_v44 }
 0x2af   :  { %640 = vmatprep.subr.mxu1 %v609_v46 }
 0x2b0   :  { %641 = vmatpush1.msra.mxu1 %v608_v48 }
 0x2b1   :  { %642 = vmatprep.subr.mxu1 %v607_v50 }
 0x2b2   :  { %643 = vmatpush1.msra.mxu1 %v606_v53 }
 0x2b3   :  { %644 = vmatprep.subr.mxu1 %v605_v55 }
 0x2b4   :  { %645 = vmatpush1.msra.mxu1 %v604_v58 }
 0x2b5   :  { %646 = vmatprep.subr.mxu1 %v603_v60 }
 0x2b6   :  { %647 = vmatpush1.msra.mxu1 %v602_v62 }
 0x2b7   :  { %648 = vmatprep.subr.mxu1 %v601_v63 }
 0x2b8   :  { %649 = vmatpush1.msra.mxu1 %v600_v0 }
 0x2b9   :  { %650 = vmatprep.subr.mxu1 %v599_v1 }
 0x2ba   :  { %651 = vmatpush1.msra.mxu1 %v598_v2 }
 0x2bb   :  { %740 = vmatmul.mubr.msk.f32.vlgmr.msra.gmra.mxu1 %vm292_vm1, %v75_v3 }
 0x37b   :  { %v686_v6 = vpop.f32.mrf.mxu1 }
 0x37c   :  { %v687_v7 = vadd.f32 %v686_v6, %v615_v5 }
 0x37d   :  { %v688_v8 = vpop.f32.mrf.mxu1 }
 0x37e   :  { %v741_v9 = vmul.f32 -1.442695, %v687_v7  ;;  %v689_v10 = vadd.f32 %v688_v8, %v615_v5 }
 0x380   :  { %750 = vpow2.f32 %v741_v9  ;;  %v742_v11 = vmul.f32 -1.442695, %v689_v10 }
 0x382   :  { %752 = vpow2.f32 %v742_v11 }
 0x38d   :  { %v751_v12 = vpop.eup %750 }
 0x38e   :  { %v697_v13 = vadd.f32 1.0, %v751_v12 }
 0x38f   :  { %v753_v14 = vpop.eup %752 }
 0x390   :  { %754 = vrcp.f32 %v697_v13  ;;  %v698_v15 = vadd.f32 1.0, %v753_v14 }
 0x392   :  { %756 = vrcp.f32 %v698_v15 }
 0x39d   :  { %v755_v16 = vpop.eup %754 }
 0x39e   :  { %703 = vst [vmem:[#allocation2] sm:$0xff] %v755_v16 }
 0x39f   :  { %v757_v17 = vpop.eup %756 }
 0x3a0   :  { %704 = vst [vmem:[#allocation2 + $0x8] sm:$0xff] %v757_v17 }
 0x3a1   :  { %769 = shalt.err (!%p766_p4)
}
 0x3a2   :  { %714 = dma.vmem_to_hbm [thread:$0]  %s712_s8, 256, %s1027_s9, [#allocation3]  }
 0x3a3   :  { %778 = dma.done.wait [#allocation3], 256  }
 0x3a4   :  { %779 = vsyncadd [#allocation3], 4294967040 }
 0x3a5   :  { %718 = vsyncpa [#allocation3], 1 }

</bundles_post_ra>
